<compile_context>
chip_gen: v7x
topology: tpu7x:2x2x1
jax: 0.10.0
libtpu: 0.0.40
codegen_flags: <defaults>
</compile_context>

<pallas_src>
import functools

import jax
import jax.numpy as jnp
from jax.experimental import pallas as pl
from jax.experimental.pallas import tpu as pltpu


def _round_up(x, m):
    return ((x + m - 1) // m) * m


# ----------------------------- Pallas kernel --------------------------------
def _generator_kernel(x_ref,
                      w0_ref, b0_ref,
                      w1_ref, b1_ref,
                      we_ref, be_ref,
                      wn_ref, bn_ref,
                      edges_ref, nodes_ref):
    """Fused MLP (Linear+Tanh stack) + two head matmuls with direct stores.

    Matmul inputs are bf16 (MXU-native on v6e/v7x, fine on v5e); accumulation,
    bias adds and tanh are float32 (v5e VPU/EUP have no bf16 elementwise).
    Outputs are stored as bf16 (HBM-writeback is the binding resource).
    """
    cd = w0_ref.dtype  # compute dtype for MXU inputs (bf16)

    # Note: x is cast to bf16 before the first matmul -> ~1e-2 overall
    # accuracy, which the demo tolerance (3e-2) accounts for.
    x = x_ref[...].astype(cd)

    # Hidden layer 0: Linear -> Tanh   (Dropout == identity in eval mode)
    h = jnp.tanh(
        jnp.dot(x, w0_ref[...], preferred_element_type=jnp.float32)
        + b0_ref[...])

    # Hidden layer 1: Linear -> Tanh
    h = jnp.tanh(
        jnp.dot(h.astype(cd), w1_ref[...], preferred_element_type=jnp.float32)
        + b1_ref[...])
    h = h.astype(cd)

    # Edges head (symmetrization + permute already folded into we/be).
    edges_ref[...] = (
        jnp.dot(h, we_ref[...], preferred_element_type=jnp.float32)
        + be_ref[...]).astype(edges_ref.dtype)

    # Nodes head.
    nodes_ref[...] = (
        jnp.dot(h, wn_ref[...], preferred_element_type=jnp.float32)
        + bn_ref[...]).astype(nodes_ref.dtype)


# --------------------------- Batch tile selection -----------------------------
def _batch_tiling(B, *, sub=16, max_tile=1024):
    """Pick (tile_b, B_pad): ~4 grid steps, >=2 when the batch allows it,
    tile capped at `max_tile`, sublane-aligned rows, minimal pad waste."""
    B_sub = _round_up(max(B, 1), sub)
    n_steps = 4 if B_sub >= 4 * sub else 2
    tb = min(max_tile, _round_up(pl.cdiv(B_sub, n_steps), sub))
    B_pad = _round_up(B_sub, tb)
    return tb, B_pad


# ------------------------------ Wrapper --------------------------------------
@functools.partial(jax.jit,
                   static_argnames=("vertexes", "edges", "nodes", "out_dtype"))
def generator_forward(x, packed, *, vertexes, edges, nodes,
                      out_dtype=jnp.bfloat16):
    """Runs the Generator forward pass.

    x:      [B, z_dim] float32
    packed: dict from pack_params() (folded/padded bf16 weights).
    Returns (edges_logits [B, V, V, E], nodes_logits [B, V, N]) in `out_dtype`.
    """
    B, z_dim = x.shape
    V, E, N = vertexes, edges, nodes
    e_dim = E * V * V
    n_dim = V * N

    z_pad = packed["w0"].shape[0]
    c0 = packed["w0"].shape[1]
    c1 = packed["w1"].shape[1]

    tb, B_pad = _batch_tiling(B)
    if B_pad != B or z_pad != z_dim:
        x = jnp.pad(x, ((0, B_pad - B), (0, z_pad - z_dim)))
    grid = (B_pad // tb,)

    # Advisory cost model for the XLA scheduler.
    flops = 2 * B_pad * (z_pad * c0 + c0 * c1 + c1 * (e_dim + n_dim))
    bytes_accessed = (
        B_pad * z_pad * 4                                   # x (f32)
        + B_pad * (e_dim + n_dim) * 2                       # bf16 outputs
        + (z_pad * c0 + c0 * c1 + c1 * (e_dim + n_dim)) * 2 # bf16 weights
        + (c0 + c1 + e_dim + n_dim) * 4)                    # f32 biases
    cost = pl.CostEstimate(flops=flops,
                           transcendentals=B_pad * (c0 + c1),
                           bytes_accessed=bytes_accessed)

    resident = lambda shape: pl.BlockSpec(shape, lambda i: (0, 0))

    edges_out, nodes_out = pl.pallas_call(
        _generator_kernel,
        out_shape=(jax.ShapeDtypeStruct((B_pad, e_dim), out_dtype),
                   jax.ShapeDtypeStruct((B_pad, n_dim), out_dtype)),
        grid_spec=pltpu.PrefetchScalarGridSpec(
            num_scalar_prefetch=0,
            grid=grid,
            in_specs=[
                pl.BlockSpec((tb, z_pad), lambda i: (i, 0)),
                resident(packed["w0"].shape), resident(packed["b0"].shape),
                resident(packed["w1"].shape), resident(packed["b1"].shape),
                resident(packed["we"].shape), resident(packed["be"].shape),
                resident(packed["wn"].shape), resident(packed["bn"].shape),
            ],
            out_specs=[
                pl.BlockSpec((tb, e_dim), lambda i: (i, 0)),
                pl.BlockSpec((tb, n_dim), lambda i: (i, 0)),
            ],
        ),
        compiler_params=pltpu.CompilerParams(
            dimension_semantics=("parallel",)),
        cost_estimate=cost,
    )(x,
      packed["w0"], packed["b0"],
      packed["w1"], packed["b1"],
      packed["we"], packed["be"],
      packed["wn"], packed["bn"])

    # Column order of the edges output is (i, j, e), so it reshapes straight
    # to [B, V, V, E] (bitcast when B == B_pad; otherwise one small slice).
    edges_logits = edges_out[:B].reshape(B, V, V, E)
    nodes_logits = nodes_out[:B].reshape(B, V, N)
    # TODO(synk): Dropout is identity here (eval mode / p=0); training-time
    # stochastic dropout would need pltpu.prng_random_bits inside the kernel.
    return edges_logits, nodes_logits


# --------------------------- Parameter packing --------------------------------
def pack_params(p, *, vertexes, edges, nodes, compute_dtype=jnp.bfloat16):
    """Fold symmetrize+permute into the edges head, lane-pad z_dim, cast.

    Edges-head column value for (i, j, e) is 0.5*(we[:, e,i,j] + we[:, e,j,i]),
    which is exactly (A + A^T)/2 followed by permute(0,2,3,1) of the logits.
    The fold is done in f32 BEFORE the bf16 cast so the (i,j,e)/(j,i,e)
    columns are bit-identical -> exact output symmetry.
    """
    V, E, N = vertexes, edges, nodes
    z_dim, c0 = p["w0"].shape
    c1 = p["w1"].shape[1]

    we = p["we"].reshape(c1, E, V, V)
    we = 0.5 * (we + jnp.swapaxes(we, 2, 3))
    we = jnp.transpose(we, (0, 2, 3, 1)).reshape(c1, V * V * E)

    be = p["be"].reshape(1, E, V, V)
    be = 0.5 * (be + jnp.swapaxes(be, 2, 3))
    be = jnp.transpose(be, (0, 2, 3, 1)).reshape(1, V * V * E)

    # Lane-pad the z dimension (rows of w0) so the x block is lane-dense.
    z_pad = _round_up(z_dim, 128)
    w0 = jnp.pad(p["w0"], ((0, z_pad - z_dim), (0, 0)))

    return dict(
        w0=w0.astype(compute_dtype), b0=p["b0"].astype(jnp.float32),
        w1=p["w1"].astype(compute_dtype), b1=p["b1"].astype(jnp.float32),
        we=we.astype(compute_dtype), be=be.astype(jnp.float32),
        wn=p["wn"].astype(compute_dtype), bn=p["bn"].astype(jnp.float32),
    )


# --------------------------- Parameter init -----------------------------------
def init_params(key, z_dim, conv_dims, vertexes, edges, nodes):
    """Deterministic parameter init (matches module __init__ shapes)."""
    assert len(conv_dims) == 2, "this script fuses a 2-hidden-layer MLP"
    c0, c1 = conv_dims
    e_dim = edges * vertexes * vertexes
    n_dim = vertexes * nodes

    ks = jax.random.split(key, 8)

    def lin(kw, kb, fan_in, fan_out):
        bound = 1.0 / jnp.sqrt(fan_in)
        w = jax.random.uniform(kw, (fan_in, fan_out), jnp.float32, -bound, bound)
        b = jax.random.uniform(kb, (1, fan_out), jnp.float32, -bound, bound)
        return w, b

    w0, b0 = lin(ks[0], ks[1], z_dim, c0)
    w1, b1 = lin(ks[2], ks[3], c0, c1)
    we, be = lin(ks[4], ks[5], c1, e_dim)
    wn, bn = lin(ks[6], ks[7], c1, n_dim)
    return dict(w0=w0, b0=b0, w1=w1, b1=b1, we=we, be=be, wn=wn, bn=bn)


# Pure-JAX f32 reference (exact PyTorch forward semantics, eval mode).
def _reference(x, p, vertexes, edges, nodes):
    h = jnp.tanh(x @ p["w0"] + p["b0"])
    h = jnp.tanh(h @ p["w1"] + p["b1"])
    e = (h @ p["we"] + p["be"]).reshape(-1, edges, vertexes, vertexes)
    e = (e + jnp.swapaxes(e, 2, 3)) / 2.0
    e = jnp.transpose(e, (0, 2, 3, 1))
    n = (h @ p["wn"] + p["bn"]).reshape(-1, vertexes, nodes)
    return e, n


# --------------------------------- main ---------------------------------------
if __name__ == "__main__":
    # Small shapes consistent with the module (MolGAN-like, scaled down).
    B = 2
    z_dim = 32
    conv_dims = [64, 128]
    vertexes = 9
    edges = 5
    nodes = 5
    dropout = 0.0  # identity -> forward semantics exact

    key = jax.random.PRNGKey(0)
    k_x, k_p = jax.random.split(key)
    x = jax.random.normal(k_x, (B, z_dim), jnp.float32)
    params = init_params(k_p, z_dim, conv_dims, vertexes, edges, nodes)
    packed = pack_params(params, vertexes=vertexes, edges=edges, nodes=nodes)

    edges_logits, nodes_logits = generator_forward(
        x, packed, vertexes=vertexes, edges=edges, nodes=nodes)
    jax.block_until_ready((edges_logits, nodes_logits))

    # Sanity-check against the pure-JAX f32 reference (kernel uses bf16 matmul
    # inputs with f32 accumulation + bf16 output storage -> loose tolerance).
    e_ref, n_ref = _reference(x, params, vertexes, edges, nodes)
    assert edges_logits.shape == (B, vertexes, vertexes, edges)
    assert nodes_logits.shape == (B, vertexes, nodes)
    # Symmetry must hold exactly by construction (folded into the weights
    # before the bf16 cast -> bit-identical (i,j,e)/(j,i,e) columns).
    assert jnp.array_equal(edges_logits, jnp.swapaxes(edges_logits, 1, 2))
    assert jnp.allclose(edges_logits.astype(jnp.float32), e_ref,
                        atol=3e-2, rtol=3e-2)
    assert jnp.allclose(nodes_logits.astype(jnp.float32), n_ref,
                        atol=3e-2, rtol=3e-2)

    print("KERNEL_OK")
</pallas_src>

<mosaic_0001>
module attributes {stable_mosaic.version = 11 : i64} {
  func.func @_generator_kernel(%arg0: i32, %arg1: memref<16x128xf32, #tpu.memory_space<vmem>>, %arg2: memref<128x64xbf16, #tpu.memory_space<vmem>>, %arg3: memref<1x64xf32, #tpu.memory_space<vmem>>, %arg4: memref<64x128xbf16, #tpu.memory_space<vmem>>, %arg5: memref<1x128xf32, #tpu.memory_space<vmem>>, %arg6: memref<128x405xbf16, #tpu.memory_space<vmem>>, %arg7: memref<1x405xf32, #tpu.memory_space<vmem>>, %arg8: memref<128x45xbf16, #tpu.memory_space<vmem>>, %arg9: memref<1x45xf32, #tpu.memory_space<vmem>>, %arg10: memref<16x405xbf16, #tpu.memory_space<vmem>>, %arg11: memref<16x45xbf16, #tpu.memory_space<vmem>>) attributes {dimension_semantics = [#tpu.dimension_semantics<parallel>], iteration_bounds = array<i64: 1>, scalar_prefetch = 0 : i64, scratch_operands = 0 : i64, tpu.core_type = #tpu.core_type<tc>, window_params = [{transform_indices = @transform_0, window_bounds = array<i64: 16, 128>}, {pipeline_mode = #tpu.pipeline_mode<synchronous>, transform_indices = @transform_1, window_bounds = array<i64: 128, 64>}, {pipeline_mode = #tpu.pipeline_mode<synchronous>, transform_indices = @transform_2, window_bounds = array<i64: 1, 64>}, {pipeline_mode = #tpu.pipeline_mode<synchronous>, transform_indices = @transform_3, window_bounds = array<i64: 64, 128>}, {pipeline_mode = #tpu.pipeline_mode<synchronous>, transform_indices = @transform_4, window_bounds = array<i64: 1, 128>}, {pipeline_mode = #tpu.pipeline_mode<synchronous>, transform_indices = @transform_5, window_bounds = array<i64: 128, 405>}, {pipeline_mode = #tpu.pipeline_mode<synchronous>, transform_indices = @transform_6, window_bounds = array<i64: 1, 405>}, {pipeline_mode = #tpu.pipeline_mode<synchronous>, transform_indices = @transform_7, window_bounds = array<i64: 128, 45>}, {pipeline_mode = #tpu.pipeline_mode<synchronous>, transform_indices = @transform_8, window_bounds = array<i64: 1, 45>}, {transform_indices = @transform_9, window_bounds = array<i64: 16, 405>}, {transform_indices = @transform_10, window_bounds = array<i64: 16, 45>}]} {
    %c0 = arith.constant 0 : index
    %c0_0 = arith.constant 0 : index
    %0 = vector.load %arg1[%c0, %c0_0] : memref<16x128xf32, #tpu.memory_space<vmem>>, vector<16x128xf32>
    %1 = arith.truncf %0 : vector<16x128xf32> to vector<16x128xbf16>
    %c0_1 = arith.constant 0 : index
    %c0_2 = arith.constant 0 : index
    %2 = vector.load %arg2[%c0_1, %c0_2] : memref<128x64xbf16, #tpu.memory_space<vmem>>, vector<128x64xbf16>
    %cst = arith.constant dense<0.000000e+00> : vector<16x64xf32>
    %3 = tpu.matmul %1, %2, %cst {dimension_numbers = #tpu.dot_dimension_numbers<[1], [0], [0], [1], [0, 0, 1, 1], [], []>} : vector<16x128xbf16>, vector<128x64xbf16>, vector<16x64xf32> -> vector<16x64xf32>
    %c0_3 = arith.constant 0 : index
    %c0_4 = arith.constant 0 : index
    %4 = vector.load %arg3[%c0_3, %c0_4] : memref<1x64xf32, #tpu.memory_space<vmem>>, vector<1x64xf32>
    %5 = vector.broadcast %4 : vector<1x64xf32> to vector<16x64xf32>
    %6 = arith.addf %3, %5 : vector<16x64xf32>
    %7 = math.tanh %6 : vector<16x64xf32>
    %8 = arith.truncf %7 : vector<16x64xf32> to vector<16x64xbf16>
    %c0_5 = arith.constant 0 : index
    %c0_6 = arith.constant 0 : index
    %9 = vector.load %arg4[%c0_5, %c0_6] : memref<64x128xbf16, #tpu.memory_space<vmem>>, vector<64x128xbf16>
    %cst_7 = arith.constant dense<0.000000e+00> : vector<16x128xf32>
    %10 = tpu.matmul %8, %9, %cst_7 {dimension_numbers = #tpu.dot_dimension_numbers<[1], [0], [0], [1], [0, 0, 1, 1], [], []>} : vector<16x64xbf16>, vector<64x128xbf16>, vector<16x128xf32> -> vector<16x128xf32>
    %c0_8 = arith.constant 0 : index
    %c0_9 = arith.constant 0 : index
    %11 = vector.load %arg5[%c0_8, %c0_9] : memref<1x128xf32, #tpu.memory_space<vmem>>, vector<1x128xf32>
    %12 = vector.broadcast %11 : vector<1x128xf32> to vector<16x128xf32>
    %13 = arith.addf %10, %12 : vector<16x128xf32>
    %14 = math.tanh %13 : vector<16x128xf32>
    %15 = arith.truncf %14 : vector<16x128xf32> to vector<16x128xbf16>
    %c0_10 = arith.constant 0 : index
    %c0_11 = arith.constant 0 : index
    %16 = vector.load %arg6[%c0_10, %c0_11] : memref<128x405xbf16, #tpu.memory_space<vmem>>, vector<128x405xbf16>
    %cst_12 = arith.constant dense<0.000000e+00> : vector<16x405xf32>
    %17 = tpu.matmul %15, %16, %cst_12 {dimension_numbers = #tpu.dot_dimension_numbers<[1], [0], [0], [1], [0, 0, 1, 1], [], []>} : vector<16x128xbf16>, vector<128x405xbf16>, vector<16x405xf32> -> vector<16x405xf32>
    %c0_13 = arith.constant 0 : index
    %c0_14 = arith.constant 0 : index
    %18 = vector.load %arg7[%c0_13, %c0_14] : memref<1x405xf32, #tpu.memory_space<vmem>>, vector<1x405xf32>
    %19 = vector.broadcast %18 : vector<1x405xf32> to vector<16x405xf32>
    %20 = arith.addf %17, %19 : vector<16x405xf32>
    %21 = arith.truncf %20 : vector<16x405xf32> to vector<16x405xbf16>
    %c0_15 = arith.constant 0 : index
    %c0_16 = arith.constant 0 : index
    %22 = vector.load %arg10[%c0_15, %c0_16] : memref<16x405xbf16, #tpu.memory_space<vmem>>, vector<16x405xbf16>
    tpu.vector_store %arg10[%c0_15, %c0_16], %21 {strides = array<i32>} : memref<16x405xbf16, #tpu.memory_space<vmem>>, vector<16x405xbf16>,
    %c0_17 = arith.constant 0 : index
    %c0_18 = arith.constant 0 : index
    %23 = vector.load %arg8[%c0_17, %c0_18] : memref<128x45xbf16, #tpu.memory_space<vmem>>, vector<128x45xbf16>
    %cst_19 = arith.constant dense<0.000000e+00> : vector<16x45xf32>
    %24 = tpu.matmul %15, %23, %cst_19 {dimension_numbers = #tpu.dot_dimension_numbers<[1], [0], [0], [1], [0, 0, 1, 1], [], []>} : vector<16x128xbf16>, vector<128x45xbf16>, vector<16x45xf32> -> vector<16x45xf32>
    %c0_20 = arith.constant 0 : index
    %c0_21 = arith.constant 0 : index
    %25 = vector.load %arg9[%c0_20, %c0_21] : memref<1x45xf32, #tpu.memory_space<vmem>>, vector<1x45xf32>
    %26 = vector.broadcast %25 : vector<1x45xf32> to vector<16x45xf32>
    %27 = arith.addf %24, %26 : vector<16x45xf32>
    %28 = arith.truncf %27 : vector<16x45xf32> to vector<16x45xbf16>
    %c0_22 = arith.constant 0 : index
    %c0_23 = arith.constant 0 : index
    %29 = vector.load %arg11[%c0_22, %c0_23] : memref<16x45xbf16, #tpu.memory_space<vmem>>, vector<16x45xbf16>
    tpu.vector_store %arg11[%c0_22, %c0_23], %28 {strides = array<i32>} : memref<16x45xbf16, #tpu.memory_space<vmem>>, vector<16x45xbf16>,
    return
  }
  func.func @transform_0(%arg0: i32) -> (i32, i32) {
    %c0_i32 = arith.constant 0 : i32
    %c0_i32_0 = arith.constant 0 : i32
    return %arg0, %c0_i32 : i32, i32
  }
  func.func @transform_1(%arg0: i32) -> (i32, i32) {
    %c0_i32 = arith.constant 0 : i32
    %c0_i32_0 = arith.constant 0 : i32
    %c0_i32_1 = arith.constant 0 : i32
    return %c0_i32, %c0_i32_0 : i32, i32
  }
  func.func @transform_2(%arg0: i32) -> (i32, i32) {
    %c0_i32 = arith.constant 0 : i32
    %c0_i32_0 = arith.constant 0 : i32
    %c0_i32_1 = arith.constant 0 : i32
    return %c0_i32, %c0_i32_0 : i32, i32
  }
  func.func @transform_3(%arg0: i32) -> (i32, i32) {
    %c0_i32 = arith.constant 0 : i32
    %c0_i32_0 = arith.constant 0 : i32
    %c0_i32_1 = arith.constant 0 : i32
    return %c0_i32, %c0_i32_0 : i32, i32
  }
  func.func @transform_4(%arg0: i32) -> (i32, i32) {
    %c0_i32 = arith.constant 0 : i32
    %c0_i32_0 = arith.constant 0 : i32
    %c0_i32_1 = arith.constant 0 : i32
    return %c0_i32, %c0_i32_0 : i32, i32
  }
  func.func @transform_5(%arg0: i32) -> (i32, i32) {
    %c0_i32 = arith.constant 0 : i32
    %c0_i32_0 = arith.constant 0 : i32
    %c0_i32_1 = arith.constant 0 : i32
    return %c0_i32, %c0_i32_0 : i32, i32
  }
  func.func @transform_6(%arg0: i32) -> (i32, i32) {
    %c0_i32 = arith.constant 0 : i32
    %c0_i32_0 = arith.constant 0 : i32
    %c0_i32_1 = arith.constant 0 : i32
    return %c0_i32, %c0_i32_0 : i32, i32
  }
  func.func @transform_7(%arg0: i32) -> (i32, i32) {
    %c0_i32 = arith.constant 0 : i32
    %c0_i32_0 = arith.constant 0 : i32
    %c0_i32_1 = arith.constant 0 : i32
    return %c0_i32, %c0_i32_0 : i32, i32
  }
  func.func @transform_8(%arg0: i32) -> (i32, i32) {
    %c0_i32 = arith.constant 0 : i32
    %c0_i32_0 = arith.constant 0 : i32
    %c0_i32_1 = arith.constant 0 : i32
    return %c0_i32, %c0_i32_0 : i32, i32
  }
  func.func @transform_9(%arg0: i32) -> (i32, i32) {
    %c0_i32 = arith.constant 0 : i32
    %c0_i32_0 = arith.constant 0 : i32
    return %arg0, %c0_i32 : i32, i32
  }
  func.func @transform_10(%arg0: i32) -> (i32, i32) {
    %c0_i32 = arith.constant 0 : i32
    %c0_i32_0 = arith.constant 0 : i32
    return %arg0, %c0_i32 : i32, i32
  }
}

</mosaic_0001>

<bundles_post_ra>
// kernel: generator_forward.1
= control target key start
LH: loop header
LB: loop body
LE: loop exit
PB: predicated region body
PF: predicated region fallthrough
CT: control target
= control target key end

     0   :  { %v924_v0 = vmov 0.0   ;;  %vm925_vm0 = vmmov 0   ;;  %vm192_vm1 = vcmask 523264   ;;  %v926_v56 = vmov 0   ;;  %s1200_s1 = inlined_call_operand.vmem [shape: bf16[128,64], index: 1, kind: input, shape index: {}]   ;;  %s1201_s0 = inlined_call_operand.vmem [shape: f32[16,128], index: 0, kind: input, shape index: {}]   ;;  %s1202_s3 = inlined_call_operand.vmem [shape: bf16[64,128], index: 3, kind: input, shape index: {}]   ;;  %s1203_s5 = inlined_call_operand.vmem [shape: bf16[128,405], index: 5, kind: input, shape index: {}]   ;;  %s1204_s2 = inlined_call_operand.vmem [shape: f32[1,64], index: 2, kind: input, shape index: {}]   ;;  %s1205_s7 = inlined_call_operand.vmem [shape: bf16[128,45], index: 7, kind: input, shape index: {}]   ;;  %s1206_s4 = inlined_call_operand.vmem [shape: f32[1,128], index: 4, kind: input, shape index: {}]   ;;  %s1207_s6 = inlined_call_operand.vmem [shape: f32[1,405], index: 6, kind: input, shape index: {}]   ;;  %s1208_s9 = inlined_call_operand.vmem [shape: bf16[16,405], index: 9, kind: output, shape index: {0}]   ;;  %s1209_s8 = inlined_call_operand.vmem [shape: f32[1,45], index: 8, kind: input, shape index: {}]   ;;  %s1210_s10 = inlined_call_operand.vmem [shape: bf16[16,45], index: 10, kind: output, shape index: {1}]  }
   0x1   :  { %793 = vmatprep.subr.bf16.mxu0 %v924_v0  ;;  %v848_v1 = vld [vmem:[%s1200_s1] sm:$0xff]   ;;  %809 = vmatprep.mubr.msk.bf16.mxu0 %vm925_vm0, %v924_v0  ;;  %v849_v2 = vld [vmem:[%s1200_s1 + $0x8] sm:$0xff]   ;;  %v850_v3 = vld [vmem:[%s1200_s1 + $0x10] sm:$0xff]   ;;  %vm565_vm2 = vcmask 1043456   ;;  %vm566_vm3 = vcmask 171012   ;;  %vm691_vm5 = vcmask 363520  }
   0x2   :  { %813 = vmatprep.subr.bf16.mxu1 %v924_v0  ;;  %821 = vmatprep.mubr.msk.bf16.mxu1 %vm925_vm0, %v924_v0  ;;  %v851_v4 = vld [vmem:[%s1200_s1 + $0x18] sm:$0xff]   ;;  %v852_v5 = vld [vmem:[%s1200_s1 + $0x20] sm:$0xff]   ;;  %v853_v6 = vld [vmem:[%s1200_s1 + $0x28] sm:$0xff]  }
   0x3   :  { %794 = vmatpush3.bf16.msra.mxu0 %v848_v1  ;;  %v854_v7 = vld [vmem:[%s1200_s1 + $0x30] sm:$0xff]   ;;  %v855_v8 = vld [vmem:[%s1200_s1 + $0x38] sm:$0xff]   ;;  %v35_v9 = vld [vmem:[%s1201_s0] sm:$0xff] }
   0x4   :  { %795 = vmatprep.subr.bf16.mxu0 %v924_v0  ;;  %v36_v10 = vld [vmem:[%s1201_s0 + $0x8] sm:$0xff]  ;;  %v856_v12 = vld [vmem:[%s1202_s3] sm:$0xff]   ;;  %v858_v14 = vld [vmem:[%s1202_s3 + $0x10] sm:$0xff]  }
   0x5   :  { %v37_v11 = vpack.c.bf16 %v36_v10, %v35_v9  ;;  %814 = vmatpush3.bf16.msra.mxu1 %v856_v12  ;;  %v857_v13 = vld [vmem:[%s1202_s3 + $0x8] sm:$0xff]   ;;  %v859_v15 = vld [vmem:[%s1202_s3 + $0x18] sm:$0xff]   ;;  %v862_v16 = vld [vmem:[%s1203_s5 + $0x4] ss:$16 sps:$4 sm:$0xff]  }
   0x6   :  { %815 = vmatprep.subr.bf16.mxu1 %v924_v0  ;;  %v863_v17 = vld [vmem:[%s1203_s5 + $0x8] ss:$16 sps:$4 sm:$0xff]   ;;  %v865_v18 = vld [vmem:[%s1203_s5 + $0xc] ss:$16 sps:$4 sm:$0xff]   ;;  %v702_v25 = vld [vmem:[%s1204_s2] ss:$0 sm:$0xff] }
   0x7   :  { %796 = vmatpush3.bf16.msra.mxu0 %v849_v2  ;;  %v869_v19 = vld [vmem:[%s1203_s5 + $0x28] ss:$16 sps:$4 sm:$0xff]   ;;  %v871_v20 = vld [vmem:[%s1203_s5 + $0x2c] ss:$16 sps:$4 sm:$0xff]   ;;  %v860_v34 = vld [vmem:[%s1203_s5] ss:$16 sps:$4 sm:$0xff]  }
   0x8   :  { %797 = vmatprep.subr.bf16.mxu0 %v924_v0  ;;  %v877_v21 = vld [vmem:[%s1203_s5 + $0x4c] ss:$16 sps:$4 sm:$0xff]   ;;  %v875_v22 = vld [vmem:[%s1203_s5 + $0x48] ss:$16 sps:$4 sm:$0xff]   ;;  %v868_v36 = vld [vmem:[%s1203_s5 + $0x24] ss:$16 sps:$4 sm:$0xff]  }
   0x9   :  { %816 = vmatpush3.bf16.msra.mxu1 %v857_v13  ;;  %v883_v23 = vld [vmem:[%s1203_s5 + $0x6c] ss:$16 sps:$4 sm:$0xff]   ;;  %v881_v24 = vld [vmem:[%s1203_s5 + $0x68] ss:$16 sps:$4 sm:$0xff]   ;;  %v866_v37 = vld [vmem:[%s1203_s5 + $0x20] ss:$16 sps:$4 sm:$0xff]  }
   0xa   :  { %817 = vmatprep.subr.bf16.mxu1 %v924_v0  ;;  %v874_v38 = vld [vmem:[%s1203_s5 + $0x44] ss:$16 sps:$4 sm:$0xff]   ;;  %v872_v39 = vld [vmem:[%s1203_s5 + $0x40] ss:$16 sps:$4 sm:$0xff]   ;;  %v889_v44 = vld [vmem:[%s1203_s5 + $0x8c] ss:$16 sps:$4 sm:$0xff]  }
   0xb   :  { %798 = vmatpush3.bf16.msra.mxu0 %v850_v3  ;;  %v880_v40 = vld [vmem:[%s1203_s5 + $0x64] ss:$16 sps:$4 sm:$0xff]   ;;  %v878_v41 = vld [vmem:[%s1203_s5 + $0x60] ss:$16 sps:$4 sm:$0xff]   ;;  %v887_v45 = vld [vmem:[%s1203_s5 + $0x88] ss:$16 sps:$4 sm:$0xff]  }
   0xc   :  { %799 = vmatprep.subr.bf16.mxu0 %v924_v0  ;;  %v886_v42 = vld [vmem:[%s1203_s5 + $0x84] ss:$16 sps:$4 sm:$0xff]   ;;  %v884_v43 = vld [vmem:[%s1203_s5 + $0x80] ss:$16 sps:$4 sm:$0xff]   ;;  %v895_v48 = vld [vmem:[%s1203_s5 + $0xac] ss:$16 sps:$4 sm:$0xff]  }
   0xd   :  { %818 = vmatpush3.bf16.msra.mxu1 %v858_v14  ;;  %v892_v46 = vld [vmem:[%s1203_s5 + $0xa4] ss:$16 sps:$4 sm:$0xff]   ;;  %v890_v47 = vld [vmem:[%s1203_s5 + $0xa0] ss:$16 sps:$4 sm:$0xff]   ;;  %v893_v49 = vld [vmem:[%s1203_s5 + $0xa8] ss:$16 sps:$4 sm:$0xff]   ;;  %v274_v14 = vlaneseq }
   0xe   :  { %819 = vmatprep.subr.bf16.mxu1 %v924_v0  ;;  %v898_v50 = vld [vmem:[%s1203_s5 + $0xc4] ss:$16 sps:$4 sm:$0xff]   ;;  %v896_v51 = vld [vmem:[%s1203_s5 + $0xc0] ss:$16 sps:$4 sm:$0xff]   ;;  %v901_v52 = vld [vmem:[%s1203_s5 + $0xcc] ss:$16 sps:$4 sm:$0xff]  }
   0xf   :  { %800 = vmatpush3.bf16.msra.mxu0 %v851_v4  ;;  %v899_v53 = vld [vmem:[%s1203_s5 + $0xc8] ss:$16 sps:$4 sm:$0xff]   ;;  %v904_v54 = vld [vmem:[%s1203_s5 + $0xe4] ss:$16 sps:$4 sm:$0xff]   ;;  %v907_v55 = vld [vmem:[%s1203_s5 + $0xec] ss:$16 sps:$4 sm:$0xff]  }
  0x10   :  { %801 = vmatprep.subr.bf16.mxu0 %v924_v0  ;;  %v902_v57 = vld [vmem:[%s1203_s5 + $0xe0] ss:$16 sps:$4 sm:$0xff]   ;;  %v905_v58 = vld [vmem:[%s1203_s5 + $0xe8] ss:$16 sps:$4 sm:$0xff]   ;;  %vm567_vm4 = vmor %vm566_vm3, %vm565_vm2 }
  0x11   :  { %820 = vmatpush3.bf16.msra.mxu1 %v859_v15  ;;  %v711_v59 = vld [vmem:[%s1206_s4] ss:$0 sm:$0xff]  ;;  %v911_v9 = vld [vmem:[%s1205_s7 + $0x18] sm:$0xff]   ;;  %v914_v12 = vld [vmem:[%s1205_s7 + $0x30] sm:$0xff]   ;;  %v275_v15 = vshrl.u32 %v274_v14, 7 }
  0x12   :  { %454 = vmatprep.subr.bf16.mxu1 %v862_v16  ;;  %v912_v10 = vld [vmem:[%s1205_s7 + $0x20] sm:$0xff]   ;;  %v915_v13 = vld [vmem:[%s1205_s7 + $0x38] sm:$0xff]  }
  0x13   :  { %802 = vmatpush3.bf16.msra.mxu0 %v852_v5  ;;  %v908_v5 = vld [vmem:[%s1205_s7] sm:$0xff]   ;;  %v276_v16 = vsub.s32 0, %v275_v15 }
  0x14   :  { %803 = vmatprep.subr.bf16.mxu0 %v924_v0 }
  0x17   :  { %804 = vmatpush3.bf16.msra.mxu0 %v853_v6 }
  0x18   :  { %805 = vmatprep.subr.bf16.mxu0 %v924_v0 }
  0x1b   :  { %806 = vmatpush3.bf16.msra.mxu0 %v854_v7  ;;  %v909_v7 = vld [vmem:[%s1205_s7 + $0x8] sm:$0xff]  }
  0x1c   :  { %807 = vmatprep.subr.bf16.mxu0 %v924_v0 }
  0x1f   :  { %808 = vmatpush3.bf16.msra.mxu0 %v855_v8  ;;  %v910_v8 = vld [vmem:[%s1205_s7 + $0x10] sm:$0xff]  }
  0x20   :  { %497 = vmatprep.subr.bf16.mxu0 %v865_v18  ;;  %v272_v18 = vld [vmem:[%s1207_s6] sm:$0xf] }
  0x22   :  { %810 = vmatmul.mubr.bf16.vlgmr.msra.gmra.mrb[0].mxu0 %v37_v11  ;;  %v913_v11 = vld [vmem:[%s1205_s7 + $0x28] sm:$0xff]  }
  0x23   :  { %498 = vmatpush1.bf16.msra.mxu0 %v863_v17  ;;  %529 = vmatprep.mubr.bf16.mxu0 %v926_v56  ;;  %v284_v17 = vsub.s32 2, %v275_v15 }
  0x24   :  { %499 = vmatprep.subr.bf16.mxu0 %v871_v20  ;;  %v288_v20 = vsub.s32 3, %v275_v15 }
  0x27   :  { %500 = vmatpush1.bf16.msra.mxu0 %v869_v19  ;;  %v280_v19 = vsub.s32 1, %v275_v15 }
  0x28   :  { %501 = vmatprep.subr.bf16.mxu0 %v877_v21  ;;  %v277_v21 = vrot.slane %v272_v18, %v276_v16 }
  0x2b   :  { %502 = vmatpush1.bf16.msra.mxu0 %v875_v22  ;;  %v285_v22 = vrot.slane %v272_v18, %v284_v17 }
  0x2c   :  { %503 = vmatprep.subr.bf16.mxu0 %v883_v23  ;;  %v281_v23 = vrot.slane %v272_v18, %v280_v19 }
  0x2f   :  { %504 = vmatpush1.bf16.msra.mxu0 %v881_v24  ;;  %v289_v24 = vrot.slane %v272_v18, %v288_v20 }
  0x30   :  { %505 = vmatprep.subr.bf16.mxu0 %v889_v44  ;;  %v753_v44 = vld [vmem:[%s1209_s8] ss:$0 sm:$0xff] }
  0x33   :  { %506 = vmatpush1.bf16.msra.mxu0 %v887_v45 }
  0x34   :  { %507 = vmatprep.subr.bf16.mxu0 %v895_v48 }
  0x37   :  { %508 = vmatpush1.bf16.msra.mxu0 %v893_v49 }
  0x38   :  { %509 = vmatprep.subr.bf16.mxu0 %v901_v52 }
  0x3b   :  { %510 = vmatpush1.bf16.msra.mxu0 %v899_v53 }
  0x3c   :  { %511 = vmatprep.subr.bf16.mxu0 %v907_v55 }
  0x3f   :  { %512 = vmatpush1.bf16.msra.mxu0 %v905_v58 }
  0xf5   :  { %v143_v26 = vpop.f32.mrb[0].mxu0 }
  0xf6   :  { %v144_v27 = vadd.f32 %v702_v25, %v143_v26  ;;  %v811_v28 = vpop.f32.mrb[1].mxu0 }
  0xf7   :  { %v146_v29 = vpop.f32.mrb[2].mxu0 }
  0xf8   :  { %v147_v30 = vadd.f32 %v702_v25, %v146_v29  ;;  %v812_v31 = vpop.f32.mrb[3].mxu0  ;;  %916 = vtanh.f32 %v144_v27 }
  0xfa   :  { %918 = vtanh.f32 %v147_v30 }
 0x102   :  { %v917_v32 = vpop.eup %916 }
 0x104   :  { %v919_v33 = vpop.eup %918 }
 0x105   :  { %v152_v35 = vpack.c.bf16 %v919_v33, %v917_v32 }
 0x107   :  { %822 = vmatmul.mubr.msk.bf16.vlgmr.msra.gmra.mrb[0].mxu1 %vm192_vm1, %v152_v35 }
 0x108   :  { %455 = vmatpush1.bf16.msra.mxu1 %v860_v34  ;;  %486 = vmatprep.mubr.bf16.mxu1 %v926_v56 }
 0x109   :  { %456 = vmatprep.subr.bf16.mxu1 %v868_v36 }
 0x10c   :  { %457 = vmatpush1.bf16.msra.mxu1 %v866_v37 }
 0x10d   :  { %458 = vmatprep.subr.bf16.mxu1 %v874_v38 }
 0x110   :  { %459 = vmatpush1.bf16.msra.mxu1 %v872_v39 }
 0x111   :  { %460 = vmatprep.subr.bf16.mxu1 %v880_v40 }
 0x114   :  { %461 = vmatpush1.bf16.msra.mxu1 %v878_v41 }
 0x115   :  { %462 = vmatprep.subr.bf16.mxu1 %v886_v42 }
 0x118   :  { %463 = vmatpush1.bf16.msra.mxu1 %v884_v43 }
 0x119   :  { %464 = vmatprep.subr.bf16.mxu1 %v892_v46 }
 0x11c   :  { %465 = vmatpush1.bf16.msra.mxu1 %v890_v47 }
 0x11d   :  { %466 = vmatprep.subr.bf16.mxu1 %v898_v50 }
 0x120   :  { %467 = vmatpush1.bf16.msra.mxu1 %v896_v51 }
 0x121   :  { %468 = vmatprep.subr.bf16.mxu1 %v904_v54 }
 0x124   :  { %469 = vmatpush1.bf16.msra.mxu1 %v902_v57 }
 0x125   :  { %825 = vmatprep.subr.bf16.mxu1 %v924_v0 }
 0x1da   :  { %v230_v60 = vpop.f32.mrb[0].mxu1 }
 0x1db   :  { %v231_v61 = vadd.f32 %v711_v59, %v230_v60  ;;  %v823_v62 = vpop.f32.mrb[1].mxu1 }
 0x1dc   :  { %v233_v63 = vpop.f32.mrb[2].mxu1 }
 0x1dd   :  { %v234_v1 = vadd.f32 %v711_v59, %v233_v63  ;;  %v824_v2 = vpop.f32.mrb[3].mxu1  ;;  %920 = vtanh.f32 %v231_v61 }
 0x1df   :  { %922 = vtanh.f32 %v234_v1 }
 0x1e7   :  { %v921_v3 = vpop.eup %920 }
 0x1e9   :  { %v923_v4 = vpop.eup %922 }
 0x1ea   :  { %v239_v6 = vpack.c.bf16 %v923_v4, %v921_v3 }
 0x1ec   :  { %487 = vmatmul.mubr.bf16.vlgmr.msra.gmra.mrb[4].mxu1 %v239_v6  ;;  %530 = vmatmul.mubr.bf16.vlgmr.msra.gmra.mrb[4].mxu0 %v239_v6 }
 0x1ed   :  { %826 = vmatpush3.bf16.msra.mxu1 %v908_v5  ;;  %841 = vmatprep.mubr.msk.bf16.mxu1 %vm925_vm0, %v924_v0 }
 0x1ee   :  { %827 = vmatprep.subr.bf16.mxu1 %v924_v0 }
 0x1f1   :  { %828 = vmatpush3.bf16.msra.mxu1 %v909_v7 }
 0x1f2   :  { %829 = vmatprep.subr.bf16.mxu1 %v924_v0 }
 0x1f5   :  { %830 = vmatpush3.bf16.msra.mxu1 %v910_v8 }
 0x1f6   :  { %831 = vmatprep.subr.bf16.mxu1 %v924_v0 }
 0x1f9   :  { %832 = vmatpush3.bf16.msra.mxu1 %v911_v9 }
 0x1fa   :  { %833 = vmatprep.subr.bf16.mxu1 %v924_v0 }
 0x1fd   :  { %834 = vmatpush3.bf16.msra.mxu1 %v912_v10 }
 0x1fe   :  { %835 = vmatprep.subr.bf16.mxu1 %v924_v0 }
 0x201   :  { %836 = vmatpush3.bf16.msra.mxu1 %v913_v11 }
 0x202   :  { %837 = vmatprep.subr.bf16.mxu1 %v924_v0 }
 0x205   :  { %838 = vmatpush3.bf16.msra.mxu1 %v914_v12 }
 0x206   :  { %839 = vmatprep.subr.bf16.mxu1 %v924_v0 }
 0x209   :  { %840 = vmatpush3.bf16.msra.mxu1 %v915_v13 }
 0x20c   :  { %842 = vmatmul.mubr.bf16.vlgmr.msra.gmra.mrb[8].mxu1 %v239_v6 }
 0x2bf   :  { %v488_v25 = vpop.f32.mrb[4].mxu1  ;;  %v531_v26 = vpop.f32.mrb[4].mxu0 }
 0x2c0   :  { %v489_v0 = vadd.f32 %v488_v25, %v277_v21  ;;  %v532_v27 = vadd.f32 %v531_v26, %v285_v22  ;;  %v490_v28 = vpop.f32.mrb[5].mxu1  ;;  %v533_v29 = vpop.f32.mrb[5].mxu0 }
 0x2c1   :  { %v491_v30 = vadd.f32 %v490_v28, %v281_v23  ;;  %v534_v31 = vadd.f32 %v533_v29, %v289_v24  ;;  %v492_v32 = vpop.f32.mrb[6].mxu1  ;;  %v535_v33 = vpop.f32.mrb[6].mxu0 }
 0x2c2   :  { %v493_v34 = vadd.f32 %v492_v32, %v277_v21  ;;  %v536_v35 = vadd.f32 %v535_v33, %v285_v22  ;;  %v494_v36 = vpop.f32.mrb[7].mxu1  ;;  %v537_v37 = vpop.f32.mrb[7].mxu0 }
 0x2c3   :  { %v764_v38 = vpack.c.bf16 %v491_v30, %v489_v0  ;;  %v765_v39 = vpack.c.bf16 %v534_v31, %v532_v27  ;;  %v495_v40 = vadd.f32 %v494_v36, %v281_v23  ;;  %v538_v41 = vadd.f32 %v537_v37, %v289_v24 }
 0x2c5   :  { %564 = vst [vmem:[%s1208_s9] sm:$0xff] %v764_v38  ;;  %568 = vst.msk [vmem:[%s1208_s9 + $0x8] sm:$0xff] %vm567_vm4, %v765_v39  ;;  %v766_v42 = vpack.c.bf16 %v495_v40, %v493_v34  ;;  %v767_v43 = vpack.c.bf16 %v538_v41, %v536_v35 }
 0x2c7   :  { %569 = vst [vmem:[%s1208_s9 + $0x10] sm:$0xff] %v766_v42  ;;  %570 = vst.msk [vmem:[%s1208_s9 + $0x18] sm:$0xff] %vm567_vm4, %v767_v43 }
 0x2df   :  { %v676_v45 = vpop.f32.mrb[8].mxu1 }
 0x2e0   :  { %v677_v46 = vadd.f32 %v753_v44, %v676_v45  ;;  %v843_v47 = vpop.f32.mrb[9].mxu1 }
 0x2e1   :  { %v679_v48 = vpop.f32.mrb[10].mxu1 }
 0x2e2   :  { %v768_v49 = vpack.c.bf16 %v677_v46, %v677_v46  ;;  %v680_v50 = vadd.f32 %v753_v44, %v679_v48  ;;  %v844_v51 = vpop.f32.mrb[11].mxu1 }
 0x2e4   :  { %692 = vst.msk [vmem:[%s1210_s10] sm:$0xf] %vm691_vm5, %v768_v49  ;;  %v769_v52 = vpack.c.bf16 %v680_v50, %v680_v50 }
 0x2e6   :  { %693 = vst.msk [vmem:[%s1210_s10 + $0x4] sm:$0xf] %vm691_vm5, %v769_v52 }

</bundles_post_ra>
